<compile_context>
chip_gen: v6e
topology: v6e:2x2x1
jax: 0.10.0
libtpu: 0.0.40
codegen_flags: <defaults>
</compile_context>

<pallas_src>
import functools

import jax
import jax.numpy as jnp
from jax.experimental import pallas as pl
from jax.experimental.pallas import tpu as pltpu

LRELU_SLOPE = 0.1
BN_EPS = 1e-5

# MXU / lane aligned tiles. For production WRN shapes use larger tm (256-512)
# and tn=256 on v6e/v7x (tn=128 on v5e); 128^3 keeps the toy demo multi-tile
# on the M axis while staying far below every generation's VMEM budget.
TM, TN, TK = 128, 128, 128


# ----------------------------- small helpers -------------------------------

def _round_up(n, m):
    return ((n + m - 1) // m) * m


def _pad2(a, rows, cols):
    pr, pc = rows - a.shape[0], cols - a.shape[1]
    if pr == 0 and pc == 0:
        return a
    return jnp.pad(a, ((0, pr), (0, pc)))


def _row(v, n):
    """(C,) -> zero-padded (1, n) float32 row for per-channel scale/shift."""
    return _pad2(v.reshape(1, -1).astype(jnp.float32), 1, n)


def _compiler_params():
    return pltpu.CompilerParams(
        dimension_semantics=("parallel", "parallel", "arbitrary"),
        vmem_limit_bytes=32 * 1024 * 1024,
    )


def fold_bn(gamma, beta, mean, var):
    """Inference-mode BN folded to per-channel scale/shift."""
    scale = gamma / jnp.sqrt(var + BN_EPS)
    shift = beta - mean * scale
    return scale, shift
# TODO(synk): training-mode BatchNorm (batch statistics + momentum update) is
# not represented; running-stats inference semantics only.


# ----------------------------- Pallas kernels ------------------------------

def _conv1_kernel(a_ref, w_ref, s1_ref, b1_ref, s2_ref, b2_ref, o_ref, acc_ref,
                  *, apply_prologue):
    """conv1 as tiled matmul with fused BN1+lrelu prologue (on the patch tile)
    and BN2+lrelu epilogue (on the f32 accumulator)."""
    k = pl.program_id(2)

    @pl.when(k == 0)
    def _init():
        acc_ref[...] = jnp.zeros_like(acc_ref)

    a = a_ref[...]                                   # bf16 (TM, TK) patch tile
    if apply_prologue:                               # relu1(bn1(.)) in f32
        af = a.astype(jnp.float32) * s1_ref[...] + b1_ref[...]
        af = jnp.where(af >= 0, af, LRELU_SLOPE * af)
        a = af.astype(jnp.bfloat16)
    acc_ref[...] += jnp.dot(a, w_ref[...], preferred_element_type=jnp.float32)

    @pl.when(k == pl.num_programs(2) - 1)
    def _epilogue():                                 # relu2(bn2(.)) in f32
        y = acc_ref[...] * s2_ref[...] + b2_ref[...]
        y = jnp.where(y >= 0, y, LRELU_SLOPE * y)
        o_ref[...] = y.astype(o_ref.dtype)


def _conv2_shortcut_kernel(a_ref, w_ref, xs_ref, ws_ref, s1_ref, b1_ref,
                           o_ref, acc_ref, *, act_shortcut):
    """conv2 as tiled matmul; epilogue computes the 1x1 shortcut conv
    (optionally preceded by BN1+lrelu) on the same output tile and adds it."""
    k = pl.program_id(2)

    @pl.when(k == 0)
    def _init():
        acc_ref[...] = jnp.zeros_like(acc_ref)

    acc_ref[...] += jnp.dot(a_ref[...], w_ref[...],
                            preferred_element_type=jnp.float32)

    @pl.when(k == pl.num_programs(2) - 1)
    def _finish():
        r = xs_ref[...]                              # f32 (TM, Cin)
        if act_shortcut:                             # activate_before_residual
            r = r * s1_ref[...] + b1_ref[...]
            r = jnp.where(r >= 0, r, LRELU_SLOPE * r)
        res = jnp.dot(r, ws_ref[...], preferred_element_type=jnp.float32)
        o_ref[...] = (acc_ref[...] + res).astype(o_ref.dtype)


def _conv2_identity_kernel(a_ref, w_ref, xs_ref, o_ref, acc_ref):
    """conv2 as tiled matmul with the identity residual added in the epilogue."""
    k = pl.program_id(2)

    @pl.when(k == 0)
    def _init():
        acc_ref[...] = jnp.zeros_like(acc_ref)

    acc_ref[...] += jnp.dot(a_ref[...], w_ref[...],
                            preferred_element_type=jnp.float32)

    @pl.when(k == pl.num_programs(2) - 1)
    def _finish():
        o_ref[...] = (acc_ref[...] + xs_ref[...]).astype(o_ref.dtype)


# --------------------------- pallas_call wrappers ---------------------------

def conv1_bn_lrelu_fused(patches, w2d, s1_9, b1_9, s2, b2, *, apply_prologue):
    """h = relu2(bn2(conv1(maybe relu1(bn1(x)))))  as one fused tiled matmul."""
    M, K = patches.shape
    Cout = w2d.shape[1]
    Mp, Kp, Np = _round_up(M, TM), _round_up(K, TK), _round_up(Cout, TN)
    a = _pad2(patches, Mp, Kp).astype(jnp.bfloat16)
    w = _pad2(w2d, Kp, Np).astype(jnp.bfloat16)

    out = pl.pallas_call(
        functools.partial(_conv1_kernel, apply_prologue=apply_prologue),
        out_shape=jax.ShapeDtypeStruct((Mp, Np), jnp.bfloat16),
        grid_spec=pltpu.PrefetchScalarGridSpec(
            num_scalar_prefetch=0,
            grid=(Mp // TM, Np // TN, Kp // TK),
            in_specs=[
                pl.BlockSpec((TM, TK), lambda i, j, k: (i, k)),
                pl.BlockSpec((TK, TN), lambda i, j, k: (k, j)),
                pl.BlockSpec((1, TK), lambda i, j, k: (0, k)),
                pl.BlockSpec((1, TK), lambda i, j, k: (0, k)),
                pl.BlockSpec((1, TN), lambda i, j, k: (0, j)),
                pl.BlockSpec((1, TN), lambda i, j, k: (0, j)),
            ],
            out_specs=pl.BlockSpec((TM, TN), lambda i, j, k: (i, j)),
            scratch_shapes=[pltpu.VMEM((TM, TN), jnp.float32)],
        ),
        compiler_params=_compiler_params(),
    )(a, w, _row(s1_9, Kp), _row(b1_9, Kp), _row(s2, Np), _row(b2, Np))
    return out[:M, :Cout]


def conv2_add_shortcut(patches, w2d, xs, ws2d, s1, b1, *, act_shortcut):
    """y = conv2(h) + convShortcut(maybe relu1(bn1(x)))  fused in one kernel."""
    M, K = patches.shape
    Cin = xs.shape[1]
    Cout = w2d.shape[1]
    Mp, Kp, Np = _round_up(M, TM), _round_up(K, TK), _round_up(Cout, TN)
    a = _pad2(patches, Mp, Kp).astype(jnp.bfloat16)
    w = _pad2(w2d, Kp, Np).astype(jnp.bfloat16)
    xs_p = _pad2(xs.astype(jnp.float32), Mp, Cin)
    ws_p = _pad2(ws2d.astype(jnp.float32), Cin, Np)   # tiny K: keep f32

    out = pl.pallas_call(
        functools.partial(_conv2_shortcut_kernel, act_shortcut=act_shortcut),
        out_shape=jax.ShapeDtypeStruct((Mp, Np), jnp.float32),
        grid_spec=pltpu.PrefetchScalarGridSpec(
            num_scalar_prefetch=0,
            grid=(Mp // TM, Np // TN, Kp // TK),
            in_specs=[
                pl.BlockSpec((TM, TK), lambda i, j, k: (i, k)),
                pl.BlockSpec((TK, TN), lambda i, j, k: (k, j)),
                pl.BlockSpec((TM, Cin), lambda i, j, k: (i, 0)),
                pl.BlockSpec((Cin, TN), lambda i, j, k: (0, j)),
                pl.BlockSpec((1, Cin), lambda i, j, k: (0, 0)),
                pl.BlockSpec((1, Cin), lambda i, j, k: (0, 0)),
            ],
            out_specs=pl.BlockSpec((TM, TN), lambda i, j, k: (i, j)),
            scratch_shapes=[pltpu.VMEM((TM, TN), jnp.float32)],
        ),
        compiler_params=_compiler_params(),
    )(a, w, xs_p, ws_p, _row(s1, Cin), _row(b1, Cin))
    return out[:M, :Cout]


def conv2_add_identity(patches, w2d, xs):
    """y = conv2(h) + x  (equalInOut residual) fused in one kernel."""
    M, K = patches.shape
    Cout = w2d.shape[1]
    Mp, Kp, Np = _round_up(M, TM), _round_up(K, TK), _round_up(Cout, TN)
    a = _pad2(patches, Mp, Kp).astype(jnp.bfloat16)
    w = _pad2(w2d, Kp, Np).astype(jnp.bfloat16)
    xs_p = _pad2(xs.astype(jnp.float32), Mp, Np)

    out = pl.pallas_call(
        _conv2_identity_kernel,
        out_shape=jax.ShapeDtypeStruct((Mp, Np), jnp.float32),
        grid_spec=pltpu.PrefetchScalarGridSpec(
            num_scalar_prefetch=0,
            grid=(Mp // TM, Np // TN, Kp // TK),
            in_specs=[
                pl.BlockSpec((TM, TK), lambda i, j, k: (i, k)),
                pl.BlockSpec((TK, TN), lambda i, j, k: (k, j)),
                pl.BlockSpec((TM, TN), lambda i, j, k: (i, j)),
            ],
            out_specs=pl.BlockSpec((TM, TN), lambda i, j, k: (i, j)),
            scratch_shapes=[pltpu.VMEM((TM, TN), jnp.float32)],
        ),
        compiler_params=_compiler_params(),
    )(a, w, xs_p)
    return out[:M, :Cout]


# ------------------------------ JAX glue -----------------------------------

def im2col_3x3(x_nhwc, stride, pad_value=None):
    """3x3, padding=1 patch extraction -> (N*Ho*Wo, 9*C), (kh, kw, c) order.
    `pad_value` (broadcastable (1,1,1,C)) lets the border carry the BN-neutral
    value so a fused BN+lrelu prologue maps it back to exactly zero."""
    N, H, W, C = x_nhwc.shape
    if pad_value is None:
        xp = jnp.pad(x_nhwc, ((0, 0), (1, 1), (1, 1), (0, 0)))
    else:
        pv = jnp.broadcast_to(pad_value.astype(x_nhwc.dtype), (1, 1, 1, C))
        xp = jnp.pad(x_nhwc - pv, ((0, 0), (1, 1), (1, 1), (0, 0))) + pv
    Ho = (H + 2 - 3) // stride + 1
    Wo = (W + 2 - 3) // stride + 1
    cols = []
    for kh in range(3):
        for kw in range(3):
            cols.append(xp[:,
                           kh: kh + (Ho - 1) * stride + 1: stride,
                           kw: kw + (Wo - 1) * stride + 1: stride,
                           :])
    patches = jnp.concatenate(cols, axis=-1)          # (N, Ho, Wo, 9*C)
    return patches.reshape(N * Ho * Wo, 9 * C), (N, Ho, Wo)


def basic_block_forward(cfg, p, x):
    """Faithful BasicBlock forward. x: NHWC float32."""
    in_p, out_p = cfg["in_planes"], cfg["out_planes"]
    stride, abr = cfg["stride"], cfg["abr"]
    equal = in_p == out_p
    N, H, W, C = x.shape
    assert C == in_p

    s1, t1 = fold_bn(p["gamma1"], p["beta1"], p["mean1"], p["var1"])
    s2, t2 = fold_bn(p["gamma2"], p["beta2"], p["mean2"], p["var2"])

    # conv1 consumes relu1(bn1(x)) unless (not equal and not abr), where the
    # reference feeds raw x (relu1(bn1(x)) is computed but unused -> skipped).
    apply_prologue = equal or abr
    if apply_prologue:
        s1_safe = jnp.where(jnp.abs(s1) < 1e-12, 1e-12, s1)  # degenerate gamma guard
        neutral = (-t1 / s1_safe).reshape(1, 1, 1, in_p)
    else:
        neutral = None

    patches1, (N_, Ho, Wo) = im2col_3x3(x, stride, pad_value=neutral)
    w1 = jnp.transpose(p["W1"], (2, 3, 1, 0)).reshape(9 * in_p, out_p)
    h = conv1_bn_lrelu_fused(patches1, w1, jnp.tile(s1, 9), jnp.tile(t1, 9),
                             s2, t2, apply_prologue=apply_prologue)
    h = h.reshape(N_, Ho, Wo, out_p)                  # bf16 activations

    # TODO(synk): dropout (dropRate > 0, training mode) not translated; the
    # dropRate=0.0 path is exact.

    patches2, _ = im2col_3x3(h, 1)
    w2 = jnp.transpose(p["W2"], (2, 3, 1, 0)).reshape(9 * out_p, out_p)

    # Residual source is raw x (subsampled when stride > 1; identity at
    # stride 1 exactly as the reference — WRN never pairs equalInOut with
    # stride > 1, which would be shape-invalid in the PyTorch module too).
    xs = x[:, ::stride, ::stride, :].reshape(N_ * Ho * Wo, in_p)

    if equal:
        y = conv2_add_identity(patches2, w2, xs)
    else:
        ws = jnp.transpose(p["Ws"], (2, 3, 1, 0)).reshape(in_p, out_p)
        y = conv2_add_shortcut(patches2, w2, xs, ws, s1, t1, act_shortcut=abr)
    return y.reshape(N_, Ho, Wo, out_p)


# --------------------------- pure-JAX reference -----------------------------

def _bn_lrelu_ref(v, gamma, beta, mean, var):
    y = (v - mean) * (gamma / jnp.sqrt(var + BN_EPS)) + beta
    return jnp.where(y >= 0, y, LRELU_SLOPE * y)


def _conv_ref(v, w_torch, stride, pad):
    w = jnp.transpose(w_torch, (2, 3, 1, 0))          # OIHW -> HWIO
    return jax.lax.conv_general_dilated(
        v, w, window_strides=(stride, stride),
        padding=((pad, pad), (pad, pad)),
        dimension_numbers=("NHWC", "HWIO", "NHWC"))


def basic_block_reference(cfg, p, x):
    equal = cfg["in_planes"] == cfg["out_planes"]
    act1 = _bn_lrelu_ref(x, p["gamma1"], p["beta1"], p["mean1"], p["var1"])
    if equal:
        conv_in, resid = act1, x
    elif cfg["abr"]:
        conv_in, resid = act1, act1
    else:
        conv_in, resid = x, x
    out = _conv_ref(conv_in, p["W1"], cfg["stride"], 1)
    out = _bn_lrelu_ref(out, p["gamma2"], p["beta2"], p["mean2"], p["var2"])
    out = _conv_ref(out, p["W2"], 1, 1)
    res = resid if equal else _conv_ref(resid, p["Ws"], cfg["stride"], 0)
    return out + res


# --------------------------- deterministic init ----------------------------

def init_basic_block_params(key, in_planes, out_planes):
    ks = jax.random.split(key, 11)

    def conv_init(k, cout, cin, ksz):
        n = ksz * ksz * cout
        return jax.random.normal(k, (cout, cin, ksz, ksz), jnp.float32) * jnp.sqrt(2.0 / n)

    p = dict(
        gamma1=1.0 + 0.2 * jax.random.normal(ks[0], (in_planes,), jnp.float32),
        beta1=0.1 * jax.random.normal(ks[1], (in_planes,), jnp.float32),
        mean1=0.1 * jax.random.normal(ks[2], (in_planes,), jnp.float32),
        var1=0.5 + jax.random.uniform(ks[3], (in_planes,), jnp.float32),
        W1=conv_init(ks[4], out_planes, in_planes, 3),
        gamma2=1.0 + 0.2 * jax.random.normal(ks[5], (out_planes,), jnp.float32),
        beta2=0.1 * jax.random.normal(ks[6], (out_planes,), jnp.float32),
        mean2=0.1 * jax.random.normal(ks[7], (out_planes,), jnp.float32),
        var2=0.5 + jax.random.uniform(ks[8], (out_planes,), jnp.float32),
        W2=conv_init(ks[9], out_planes, out_planes, 3),
    )
    if in_planes != out_planes:
        p["Ws"] = conv_init(ks[10], out_planes, in_planes, 1)
    return p


def make_block_fn(cfg, p):
    @jax.jit
    def fwd(xin):
        return basic_block_forward(cfg, p, xin)
    return fwd


# --------------------------------- main -------------------------------------

if __name__ == "__main__":
    key = jax.random.PRNGKey(0)
    kx, kp = jax.random.split(key)

    N, Cin0, H, W = 2, 4, 16, 16
    x_nchw = jax.random.normal(kx, (N, Cin0, H, W), jnp.float32)
    x = jnp.transpose(x_nchw, (0, 2, 3, 1))            # NCHW -> NHWC

    # Three BasicBlock configs covering every forward branch:
    #  (a) in!=out, stride 1, activate_before_residual=True  (WRN block1 style)
    #  (b) in==out  (identity residual)
    #  (c) in!=out, stride 2, activate_before_residual=False (WRN block2/3 style)
    configs = [
        dict(in_planes=4, out_planes=8, stride=1, abr=True),
        dict(in_planes=8, out_planes=8, stride=1, abr=False),
        dict(in_planes=8, out_planes=16, stride=2, abr=False),
    ]

    cur = x
    for idx, cfg in enumerate(configs):
        p = init_basic_block_params(jax.random.fold_in(kp, idx),
                                    cfg["in_planes"], cfg["out_planes"])
        y = jax.block_until_ready(make_block_fn(cfg, p)(cur))
        y_ref = basic_block_reference(cfg, p, cur)
        assert y.shape == y_ref.shape, (y.shape, y_ref.shape)
        assert bool(jnp.all(jnp.isfinite(y)))
        assert bool(jnp.allclose(y, y_ref, rtol=5e-2, atol=1e-1)), (
            idx, float(jnp.max(jnp.abs(y - y_ref))))
        cur = y

    out_nchw = jnp.transpose(cur, (0, 3, 1, 2))        # back to NCHW convention
    assert out_nchw.shape == (N, 16, H // 2, W // 2), out_nchw.shape
    print("KERNEL_OK")
</pallas_src>

<mosaic_0001>
module attributes {stable_mosaic.version = 11 : i64} {
  func.func @_conv1_kernel(%arg0: i32, %arg1: i32, %arg2: i32, %arg3: memref<128x128xbf16, #tpu.memory_space<vmem>>, %arg4: memref<128x128xbf16, #tpu.memory_space<vmem>>, %arg5: memref<1x128xf32, #tpu.memory_space<vmem>>, %arg6: memref<1x128xf32, #tpu.memory_space<vmem>>, %arg7: memref<1x128xf32, #tpu.memory_space<vmem>>, %arg8: memref<1x128xf32, #tpu.memory_space<vmem>>, %arg9: memref<128x128xbf16, #tpu.memory_space<vmem>>, %arg10: memref<128x128xf32, #tpu.memory_space<vmem>>) attributes {dimension_semantics = [#tpu.dimension_semantics<parallel>, #tpu.dimension_semantics<parallel>, #tpu.dimension_semantics<arbitrary>], iteration_bounds = array<i64: 4, 1, 1>, scalar_prefetch = 0 : i64, scratch_operands = 1 : i64, tpu.core_type = #tpu.core_type<tc>, window_params = [{transform_indices = @transform_0, window_bounds = array<i64: 128, 128>}, {transform_indices = @transform_1, window_bounds = array<i64: 128, 128>}, {transform_indices = @transform_2, window_bounds = array<i64: 1, 128>}, {transform_indices = @transform_3, window_bounds = array<i64: 1, 128>}, {transform_indices = @transform_4, window_bounds = array<i64: 1, 128>}, {transform_indices = @transform_5, window_bounds = array<i64: 1, 128>}, {transform_indices = @transform_6, window_bounds = array<i64: 128, 128>}]} {
    %c0_i32 = arith.constant 0 : i32
    %0 = arith.cmpi eq, %arg2, %c0_i32 : i32
    %1 = arith.extui %0 : i1 to i32
    %c0_i32_0 = arith.constant 0 : i32
    %2 = arith.cmpi ne, %1, %c0_i32_0 : i32
    scf.if %2 {
      %cst_16 = arith.constant 0.000000e+00 : f32
      %25 = vector.broadcast %cst_16 : f32 to vector<128x128xf32>
      %c0_17 = arith.constant 0 : index
      %c0_18 = arith.constant 0 : index
      %26 = vector.load %arg10[%c0_17, %c0_18] : memref<128x128xf32, #tpu.memory_space<vmem>>, vector<128x128xf32>
      tpu.vector_store %arg10[%c0_17, %c0_18], %25 {strides = array<i32>} : memref<128x128xf32, #tpu.memory_space<vmem>>, vector<128x128xf32>,
    } else {
    }
    %c0 = arith.constant 0 : index
    %c0_1 = arith.constant 0 : index
    %3 = vector.load %arg3[%c0, %c0_1] : memref<128x128xbf16, #tpu.memory_space<vmem>>, vector<128x128xbf16>
    %4 = arith.extf %3 : vector<128x128xbf16> to vector<128x128xf32>
    %c0_2 = arith.constant 0 : index
    %c0_3 = arith.constant 0 : index
    %5 = vector.load %arg5[%c0_2, %c0_3] : memref<1x128xf32, #tpu.memory_space<vmem>>, vector<1x128xf32>
    %6 = vector.broadcast %5 : vector<1x128xf32> to vector<128x128xf32>
    %7 = arith.mulf %4, %6 : vector<128x128xf32>
    %c0_4 = arith.constant 0 : index
    %c0_5 = arith.constant 0 : index
    %8 = vector.load %arg6[%c0_4, %c0_5] : memref<1x128xf32, #tpu.memory_space<vmem>>, vector<1x128xf32>
    %9 = vector.broadcast %8 : vector<1x128xf32> to vector<128x128xf32>
    %10 = arith.addf %7, %9 : vector<128x128xf32>
    %cst = arith.constant 0.000000e+00 : f32
    %11 = vector.broadcast %cst : f32 to vector<128x128xf32>
    %12 = arith.cmpf oge, %10, %11 : vector<128x128xf32>
    %cst_6 = arith.constant 1.000000e-01 : f32
    %13 = vector.broadcast %cst_6 : f32 to vector<128x128xf32>
    %14 = arith.mulf %13, %10 : vector<128x128xf32>
    %15 = arith.select %12, %10, %14 : vector<128x128xi1>, vector<128x128xf32>
    %16 = arith.truncf %15 : vector<128x128xf32> to vector<128x128xbf16>
    %c0_7 = arith.constant 0 : index
    %c0_8 = arith.constant 0 : index
    %17 = vector.load %arg10[%c0_7, %c0_8] : memref<128x128xf32, #tpu.memory_space<vmem>>, vector<128x128xf32>
    %c0_9 = arith.constant 0 : index
    %c0_10 = arith.constant 0 : index
    %18 = vector.load %arg4[%c0_9, %c0_10] : memref<128x128xbf16, #tpu.memory_space<vmem>>, vector<128x128xbf16>
    %cst_11 = arith.constant dense<0.000000e+00> : vector<128x128xf32>
    %19 = tpu.matmul %16, %18, %cst_11 {dimension_numbers = #tpu.dot_dimension_numbers<[1], [0], [0], [1], [0, 0, 1, 1], [], []>} : vector<128x128xbf16>, vector<128x128xbf16>, vector<128x128xf32> -> vector<128x128xf32>
    %20 = arith.addf %17, %19 : vector<128x128xf32>
    %c0_12 = arith.constant 0 : index
    %c0_13 = arith.constant 0 : index
    %21 = vector.load %arg10[%c0_12, %c0_13] : memref<128x128xf32, #tpu.memory_space<vmem>>, vector<128x128xf32>
    tpu.vector_store %arg10[%c0_12, %c0_13], %20 {strides = array<i32>} : memref<128x128xf32, #tpu.memory_space<vmem>>, vector<128x128xf32>,
    %c0_i32_14 = arith.constant 0 : i32
    %22 = arith.cmpi eq, %arg2, %c0_i32_14 : i32
    %23 = arith.extui %22 : i1 to i32
    %c0_i32_15 = arith.constant 0 : i32
    %24 = arith.cmpi ne, %23, %c0_i32_15 : i32
    scf.if %24 {
      %c0_16 = arith.constant 0 : index
      %c0_17 = arith.constant 0 : index
      %25 = vector.load %arg10[%c0_16, %c0_17] : memref<128x128xf32, #tpu.memory_space<vmem>>, vector<128x128xf32>
      %c0_18 = arith.constant 0 : index
      %c0_19 = arith.constant 0 : index
      %26 = vector.load %arg7[%c0_18, %c0_19] : memref<1x128xf32, #tpu.memory_space<vmem>>, vector<1x128xf32>
      %27 = vector.broadcast %26 : vector<1x128xf32> to vector<128x128xf32>
      %28 = arith.mulf %25, %27 : vector<128x128xf32>
      %c0_20 = arith.constant 0 : index
      %c0_21 = arith.constant 0 : index
      %29 = vector.load %arg8[%c0_20, %c0_21] : memref<1x128xf32, #tpu.memory_space<vmem>>, vector<1x128xf32>
      %30 = vector.broadcast %29 : vector<1x128xf32> to vector<128x128xf32>
      %31 = arith.addf %28, %30 : vector<128x128xf32>
      %cst_22 = arith.constant 0.000000e+00 : f32
      %32 = vector.broadcast %cst_22 : f32 to vector<128x128xf32>
      %33 = arith.cmpf oge, %31, %32 : vector<128x128xf32>
      %cst_23 = arith.constant 1.000000e-01 : f32
      %34 = vector.broadcast %cst_23 : f32 to vector<128x128xf32>
      %35 = arith.mulf %34, %31 : vector<128x128xf32>
      %36 = arith.select %33, %31, %35 : vector<128x128xi1>, vector<128x128xf32>
      %37 = arith.truncf %36 : vector<128x128xf32> to vector<128x128xbf16>
      %c0_24 = arith.constant 0 : index
      %c0_25 = arith.constant 0 : index
      %38 = vector.load %arg9[%c0_24, %c0_25] : memref<128x128xbf16, #tpu.memory_space<vmem>>, vector<128x128xbf16>
      tpu.vector_store %arg9[%c0_24, %c0_25], %37 {strides = array<i32>} : memref<128x128xbf16, #tpu.memory_space<vmem>>, vector<128x128xbf16>,
    } else {
    }
    return
  }
  func.func @transform_0(%arg0: i32, %arg1: i32, %arg2: i32) -> (i32, i32) {
    %c0_i32 = arith.constant 0 : i32
    return %arg0, %arg2 : i32, i32
  }
  func.func @transform_1(%arg0: i32, %arg1: i32, %arg2: i32) -> (i32, i32) {
    %c0_i32 = arith.constant 0 : i32
    return %arg2, %arg1 : i32, i32
  }
  func.func @transform_2(%arg0: i32, %arg1: i32, %arg2: i32) -> (i32, i32) {
    %c0_i32 = arith.constant 0 : i32
    %c0_i32_0 = arith.constant 0 : i32
    return %c0_i32, %arg2 : i32, i32
  }
  func.func @transform_3(%arg0: i32, %arg1: i32, %arg2: i32) -> (i32, i32) {
    %c0_i32 = arith.constant 0 : i32
    %c0_i32_0 = arith.constant 0 : i32
    return %c0_i32, %arg2 : i32, i32
  }
  func.func @transform_4(%arg0: i32, %arg1: i32, %arg2: i32) -> (i32, i32) {
    %c0_i32 = arith.constant 0 : i32
    %c0_i32_0 = arith.constant 0 : i32
    return %c0_i32, %arg1 : i32, i32
  }
  func.func @transform_5(%arg0: i32, %arg1: i32, %arg2: i32) -> (i32, i32) {
    %c0_i32 = arith.constant 0 : i32
    %c0_i32_0 = arith.constant 0 : i32
    return %c0_i32, %arg1 : i32, i32
  }
  func.func @transform_6(%arg0: i32, %arg1: i32, %arg2: i32) -> (i32, i32) {
    %c0_i32 = arith.constant 0 : i32
    return %arg0, %arg1 : i32, i32
  }
}

module attributes {stable_mosaic.version = 11 : i64} {
  func.func @_conv2_shortcut_kernel(%arg0: i32, %arg1: i32, %arg2: i32, %arg3: memref<128x128xbf16, #tpu.memory_space<vmem>>, %arg4: memref<128x128xbf16, #tpu.memory_space<vmem>>, %arg5: memref<128x4xf32, #tpu.memory_space<vmem>>, %arg6: memref<4x128xf32, #tpu.memory_space<vmem>>, %arg7: memref<1x4xf32, #tpu.memory_space<vmem>>, %arg8: memref<1x4xf32, #tpu.memory_space<vmem>>, %arg9: memref<128x128xf32, #tpu.memory_space<vmem>>, %arg10: memref<128x128xf32, #tpu.memory_space<vmem>>) attributes {dimension_semantics = [#tpu.dimension_semantics<parallel>, #tpu.dimension_semantics<parallel>, #tpu.dimension_semantics<arbitrary>], iteration_bounds = array<i64: 4, 1, 1>, scalar_prefetch = 0 : i64, scratch_operands = 1 : i64, tpu.core_type = #tpu.core_type<tc>, window_params = [{transform_indices = @transform_0, window_bounds = array<i64: 128, 128>}, {transform_indices = @transform_1, window_bounds = array<i64: 128, 128>}, {transform_indices = @transform_2, window_bounds = array<i64: 128, 4>}, {transform_indices = @transform_3, window_bounds = array<i64: 4, 128>}, {pipeline_mode = #tpu.pipeline_mode<synchronous>, transform_indices = @transform_4, window_bounds = array<i64: 1, 4>}, {pipeline_mode = #tpu.pipeline_mode<synchronous>, transform_indices = @transform_5, window_bounds = array<i64: 1, 4>}, {transform_indices = @transform_6, window_bounds = array<i64: 128, 128>}]} {
    %c0_i32 = arith.constant 0 : i32
    %0 = arith.cmpi eq, %arg2, %c0_i32 : i32
    %1 = arith.extui %0 : i1 to i32
    %c0_i32_0 = arith.constant 0 : i32
    %2 = arith.cmpi ne, %1, %c0_i32_0 : i32
    scf.if %2 {
      %cst_10 = arith.constant 0.000000e+00 : f32
      %12 = vector.broadcast %cst_10 : f32 to vector<128x128xf32>
      %c0_11 = arith.constant 0 : index
      %c0_12 = arith.constant 0 : index
      %13 = vector.load %arg10[%c0_11, %c0_12] : memref<128x128xf32, #tpu.memory_space<vmem>>, vector<128x128xf32>
      tpu.vector_store %arg10[%c0_11, %c0_12], %12 {strides = array<i32>} : memref<128x128xf32, #tpu.memory_space<vmem>>, vector<128x128xf32>,
    } else {
    }
    %c0 = arith.constant 0 : index
    %c0_1 = arith.constant 0 : index
    %3 = vector.load %arg10[%c0, %c0_1] : memref<128x128xf32, #tpu.memory_space<vmem>>, vector<128x128xf32>
    %c0_2 = arith.constant 0 : index
    %c0_3 = arith.constant 0 : index
    %4 = vector.load %arg3[%c0_2, %c0_3] : memref<128x128xbf16, #tpu.memory_space<vmem>>, vector<128x128xbf16>
    %c0_4 = arith.constant 0 : index
    %c0_5 = arith.constant 0 : index
    %5 = vector.load %arg4[%c0_4, %c0_5] : memref<128x128xbf16, #tpu.memory_space<vmem>>, vector<128x128xbf16>
    %cst = arith.constant dense<0.000000e+00> : vector<128x128xf32>
    %6 = tpu.matmul %4, %5, %cst {dimension_numbers = #tpu.dot_dimension_numbers<[1], [0], [0], [1], [0, 0, 1, 1], [], []>} : vector<128x128xbf16>, vector<128x128xbf16>, vector<128x128xf32> -> vector<128x128xf32>
    %7 = arith.addf %3, %6 : vector<128x128xf32>
    %c0_6 = arith.constant 0 : index
    %c0_7 = arith.constant 0 : index
    %8 = vector.load %arg10[%c0_6, %c0_7] : memref<128x128xf32, #tpu.memory_space<vmem>>, vector<128x128xf32>
    tpu.vector_store %arg10[%c0_6, %c0_7], %7 {strides = array<i32>} : memref<128x128xf32, #tpu.memory_space<vmem>>, vector<128x128xf32>,
    %c0_i32_8 = arith.constant 0 : i32
    %9 = arith.cmpi eq, %arg2, %c0_i32_8 : i32
    %10 = arith.extui %9 : i1 to i32
    %c0_i32_9 = arith.constant 0 : i32
    %11 = arith.cmpi ne, %10, %c0_i32_9 : i32
    scf.if %11 {
      %c0_10 = arith.constant 0 : index
      %c0_11 = arith.constant 0 : index
      %12 = vector.load %arg5[%c0_10, %c0_11] : memref<128x4xf32, #tpu.memory_space<vmem>>, vector<128x4xf32>
      %c0_12 = arith.constant 0 : index
      %c0_13 = arith.constant 0 : index
      %13 = vector.load %arg7[%c0_12, %c0_13] : memref<1x4xf32, #tpu.memory_space<vmem>>, vector<1x4xf32>
      %14 = vector.broadcast %13 : vector<1x4xf32> to vector<128x4xf32>
      %15 = arith.mulf %12, %14 : vector<128x4xf32>
      %c0_14 = arith.constant 0 : index
      %c0_15 = arith.constant 0 : index
      %16 = vector.load %arg8[%c0_14, %c0_15] : memref<1x4xf32, #tpu.memory_space<vmem>>, vector<1x4xf32>
      %17 = vector.broadcast %16 : vector<1x4xf32> to vector<128x4xf32>
      %18 = arith.addf %15, %17 : vector<128x4xf32>
      %cst_16 = arith.constant 0.000000e+00 : f32
      %19 = vector.broadcast %cst_16 : f32 to vector<128x4xf32>
      %20 = arith.cmpf oge, %18, %19 : vector<128x4xf32>
      %cst_17 = arith.constant 1.000000e-01 : f32
      %21 = vector.broadcast %cst_17 : f32 to vector<128x4xf32>
      %22 = arith.mulf %21, %18 : vector<128x4xf32>
      %23 = arith.select %20, %18, %22 : vector<128x4xi1>, vector<128x4xf32>
      %c0_18 = arith.constant 0 : index
      %c0_19 = arith.constant 0 : index
      %24 = vector.load %arg6[%c0_18, %c0_19] : memref<4x128xf32, #tpu.memory_space<vmem>>, vector<4x128xf32>
      %cst_20 = arith.constant dense<0.000000e+00> : vector<128x128xf32>
      %25 = tpu.matmul %23, %24, %cst_20 {dimension_numbers = #tpu.dot_dimension_numbers<[1], [0], [0], [1], [0, 0, 1, 1], [], []>} : vector<128x4xf32>, vector<4x128xf32>, vector<128x128xf32> -> vector<128x128xf32>
      %c0_21 = arith.constant 0 : index
      %c0_22 = arith.constant 0 : index
      %26 = vector.load %arg10[%c0_21, %c0_22] : memref<128x128xf32, #tpu.memory_space<vmem>>, vector<128x128xf32>
      %27 = arith.addf %26, %25 : vector<128x128xf32>
      %c0_23 = arith.constant 0 : index
      %c0_24 = arith.constant 0 : index
      %28 = vector.load %arg9[%c0_23, %c0_24] : memref<128x128xf32, #tpu.memory_space<vmem>>, vector<128x128xf32>
      tpu.vector_store %arg9[%c0_23, %c0_24], %27 {strides = array<i32>} : memref<128x128xf32, #tpu.memory_space<vmem>>, vector<128x128xf32>,
    } else {
    }
    return
  }
  func.func @transform_0(%arg0: i32, %arg1: i32, %arg2: i32) -> (i32, i32) {
    %c0_i32 = arith.constant 0 : i32
    return %arg0, %arg2 : i32, i32
  }
  func.func @transform_1(%arg0: i32, %arg1: i32, %arg2: i32) -> (i32, i32) {
    %c0_i32 = arith.constant 0 : i32
    return %arg2, %arg1 : i32, i32
  }
  func.func @transform_2(%arg0: i32, %arg1: i32, %arg2: i32) -> (i32, i32) {
    %c0_i32 = arith.constant 0 : i32
    %c0_i32_0 = arith.constant 0 : i32
    return %arg0, %c0_i32 : i32, i32
  }
  func.func @transform_3(%arg0: i32, %arg1: i32, %arg2: i32) -> (i32, i32) {
    %c0_i32 = arith.constant 0 : i32
    %c0_i32_0 = arith.constant 0 : i32
    return %c0_i32, %arg1 : i32, i32
  }
  func.func @transform_4(%arg0: i32, %arg1: i32, %arg2: i32) -> (i32, i32) {
    %c0_i32 = arith.constant 0 : i32
    %c0_i32_0 = arith.constant 0 : i32
    %c0_i32_1 = arith.constant 0 : i32
    return %c0_i32, %c0_i32_0 : i32, i32
  }
  func.func @transform_5(%arg0: i32, %arg1: i32, %arg2: i32) -> (i32, i32) {
    %c0_i32 = arith.constant 0 : i32
    %c0_i32_0 = arith.constant 0 : i32
    %c0_i32_1 = arith.constant 0 : i32
    return %c0_i32, %c0_i32_0 : i32, i32
  }
  func.func @transform_6(%arg0: i32, %arg1: i32, %arg2: i32) -> (i32, i32) {
    %c0_i32 = arith.constant 0 : i32
    return %arg0, %arg1 : i32, i32
  }
}

</mosaic_0001>

<bundles_post_ra>
// kernel: tile.10
= control target key start
LH: loop header
LB: loop body
LE: loop exit
PB: predicated region body
PF: predicated region fallthrough
CT: control target
= control target key end

     0   :  { %s28_s0 = inlined_call_operand.vmem [shape: f32[4], index: 0, kind: input, shape index: {}]   ;;  %s29_s1 = inlined_call_operand.vmem [shape: f32[9,4], index: 1, kind: output, shape index: {}]  }
   0x1   :  { %v4_v0 = vld [vmem:[%s28_s0] ss:$0 sm:$0xff] }
   0x2   :  { %5 = vst [vmem:[%s29_s1] sm:$0xff] %v4_v0  ;;  %8 = vst [vmem:[%s29_s1 + $0x8] sm:$0xff] %v4_v0 }

// kernel: tile.14
= control target key start
LH: loop header
LB: loop body
LE: loop exit
PB: predicated region body
PF: predicated region fallthrough
CT: control target
= control target key end

     0   :  { %s77_s10 = smov 32   ;;  %s78_s11 = smov 24   ;;  %vm3_vm0 = vcmask 31744   ;;  %vm9_vm1 = vcmask 294144   ;;  %vm15_vm2 = vcmask 261344   ;;  %vm21_vm3 = vcmask 228544   ;;  %s125_s0 = inlined_call_operand.vmem [shape: f32[9,4], index: 0, kind: input, shape index: {}]   ;;  %s126_s1 = inlined_call_operand.vmem [shape: f32[1,36], index: 1, kind: output, shape index: {}]  }
   0x1   :  { %v61_v0 = vld [vmem:[%s125_s0 + $0x8] sm:$0x1]   ;;  %v63_v1 = vld [vmem:[%s125_s0 + $0x6] sm:$0x1]   ;;  %v62_v2 = vld [vmem:[%s125_s0 + $0x7] sm:$0x1]  }
   0x2   :  { %7 = vrot.lane.b32.xlu0 %v61_v0, %s77_s10  ;;  %19 = vrot.lane.b32.xlu1 %v63_v1, %s78_s11  ;;  %v64_v3 = vld [vmem:[%s125_s0 + $0x5] sm:$0x1]   ;;  %v2_v4 = vld [vmem:[%s125_s0] sm:$0x1]   ;;  %s79_s18 = smov 28   ;;  %s80_s19 = smov 20  }
   0x3   :  { %4 = vst.msk [vmem:[#allocation0] sm:$0x1] %vm3_vm0, %v2_v4   ;;  %v65_v5 = vld [vmem:[%s125_s0 + $0x4] sm:$0x1]   ;;  %v66_v6 = vld [vmem:[%s125_s0 + $0x3] sm:$0x1]  }
   0x4   :  { %s81_s24 = smov 16   ;;  %s82_s25 = smov 12   ;;  %v67_v7 = vld [vmem:[%s125_s0 + $0x2] sm:$0x1]   ;;  %v68_v8 = vld [vmem:[%s125_s0 + $0x1] sm:$0x1]  }
   0x5   :  { %s83_s0 = smov 8   ;;  %s84_s30 = smov 4   ;;  %vm27_vm4 = vcmask 195744   ;;  %vm33_vm5 = vcmask 162944   ;;  %vm39_vm6 = vcmask 130144   ;;  %vm45_vm7 = vcmask 97344  }
   0x6   :  { %13 = vrot.lane.b32.xlu0 %v62_v2, %s79_s18  ;;  %25 = vrot.lane.b32.xlu1 %v64_v3, %s80_s19  ;;  %vm51_vm8 = vcmask 64544  }
   0xa   :  { %31 = vrot.lane.b32.xlu0 %v65_v5, %s81_s24  ;;  %37 = vrot.lane.b32.xlu1 %v66_v6, %s82_s25 }
   0xe   :  { %43 = vrot.lane.b32.xlu0 %v67_v7, %s83_s0  ;;  %49 = vrot.lane.b32.xlu1 %v68_v8, %s84_s30 }
  0x74   :  { %v8_v9 = vpop.permute.xlu0 %7   ;;  %v20_v10 = vpop.permute.xlu1 %19  }
  0x75   :  { %10 = vst.msk [vmem:[#allocation0] sm:$0x1] %vm9_vm1, %v8_v9  }
  0x78   :  { %v14_v11 = vpop.permute.xlu0 %13   ;;  %v26_v12 = vpop.permute.xlu1 %25  }
  0x79   :  { %16 = vst.msk [vmem:[#allocation0] sm:$0x1] %vm15_vm2, %v14_v11  }
  0x7a   :  { %22 = vst.msk [vmem:[#allocation0] sm:$0x1] %vm21_vm3, %v20_v10  }
  0x7b   :  { %28 = vst.msk [vmem:[#allocation0] sm:$0x1] %vm27_vm4, %v26_v12  }
  0x7c   :  { %v32_v13 = vpop.permute.xlu0 %31   ;;  %v38_v14 = vpop.permute.xlu1 %37  }
  0x7d   :  { %34 = vst.msk [vmem:[#allocation0] sm:$0x1] %vm33_vm5, %v32_v13  }
  0x7e   :  { %40 = vst.msk [vmem:[#allocation0] sm:$0x1] %vm39_vm6, %v38_v14  }
  0x80   :  { %v44_v15 = vpop.permute.xlu0 %43   ;;  %v50_v16 = vpop.permute.xlu1 %49  }
  0x81   :  { %46 = vst.msk [vmem:[#allocation0] sm:$0x1] %vm45_vm7, %v44_v15  }
  0x82   :  { %52 = vst.msk [vmem:[#allocation0] sm:$0x1] %vm51_vm8, %v50_v16  }
  0x89   :  { %v57_v17 = vld [vmem:[#allocation0] sm:$0x1] }
  0x8a   :  { %60 = vst [vmem:[%s126_s1] sm:$0x1] %v57_v17 }

// kernel: fwd.2
= control target key start
LH: loop header
LB: loop body
LE: loop exit
PB: predicated region body
PF: predicated region fallthrough
CT: control target
= control target key end

     0   :  { %s1387_s21 = smov 0   ;;  %s1389_s22 = smov 0   ;;  %s1564_s0 = inlined_call_operand.vmem [shape: bf16[512,128], index: 0, kind: input, shape index: {}]   ;;  %s1565_s1 = inlined_call_operand.vmem [shape: bf16[128,128], index: 1, kind: input, shape index: {}]   ;;  %s1566_s2 = inlined_call_operand.vmem [shape: f32[1,128], index: 2, kind: input, shape index: {}]   ;;  %s1567_s3 = inlined_call_operand.vmem [shape: f32[1,128], index: 3, kind: input, shape index: {}]   ;;  %s1568_s4 = inlined_call_operand.vmem [shape: f32[1,128], index: 4, kind: input, shape index: {}]   ;;  %s1569_s5 = inlined_call_operand.vmem [shape: f32[1,128], index: 5, kind: input, shape index: {}]   ;;  %s1570_s6 = inlined_call_operand.vmem [shape: bf16[512,128], index: 6, kind: output, shape index: {}]  }
   0x1   :  { %s1391_s23 = smov 0  }
   0x2 LB: > { %s35_s24 = sadd.s32 1, %s1346_s22  ;;  %p1095_p0 = scmp.ge.s32.totalorder %s1350_s23, 1  ;;  %s1350_s23 = sphi %s1391_s23, %s16_s23   ;;  %s1346_s22 = sphi %s1389_s22, %s1572_s22   ;;  %s1342_s21 = sphi %s1387_s21, %s1571_s21  }
   0x3   : > { %p37_p1 = scmp.ge.s32.totalorder %s35_s24, 4  ;;  %p287_p2 = scmp.lt.s32.totalorder %s1350_s23, 5 }
   0x5   : > { %s1574_s24 = smov (%p37_p1, %s35_s24), 0  ;;  %p288_p3 = pnand %p1095_p0, %p287_p2 }
   0x6   : > { %s1096_s27 = sshll.u32 (!%p288_p3), %s1342_s21, 4 }
   0x7   : > { %291 = sbr.rel (%p288_p3) target bundleno = 267 (0x10b), region = 44  ;;  %p344_p4 = scmp.lt.s32.totalorder (!%p288_p3), %s1096_s27, 63 }
   0xc   : > { %v1320_v0 = vld [vmem:[%s1565_s1 + $0x38] sm:$0xff]   ;;  %v1321_v1 = vld [vmem:[%s1565_s1 + $0x30] sm:$0xff]   ;;  %s1576_s27 = smov (!%p344_p4, %s1096_s27), 63  ;;  %v1322_v2 = vld [vmem:[%s1565_s1 + $0x28] sm:$0xff]  }
   0xd   : > { %1248 = vmatprep.subr.bf16.mxu0 %v1320_v0  ;;  %1280 = vmatprep.subr.bf16.mxu1 %v1320_v0  ;;  %s1097_s8 = sshll.u32 %s1576_s27, 2  ;;  %v1323_v3 = vld [vmem:[%s1565_s1 + $0x20] sm:$0xff]   ;;  %v1324_v21 = vld [vmem:[%s1565_s1 + $0x18] sm:$0xff]   ;;  %v1325_v30 = vld [vmem:[%s1565_s1 + $0x10] sm:$0xff]  }
   0xe   : > { %1249 = vmatpush3.bf16.msra.mxu0 %v1320_v0  ;;  %1288 = vmatpush3.bf16.msra.mxu1 %v1320_v0  ;;  %s1422_s11 = scalar_lea.vmem %s1564_s0, %s1097_s8  ;;  %v1431_v5 = vld [vmem:[%s1566_s2] ss:$0 sm:$0xff]  ;;  %v1326_v50 = vld [vmem:[%s1565_s1 + $0x8] sm:$0xff]   ;;  %s1530_s13 = scalar_lea.vmem %s1570_s6, %s1097_s8 }
   0xf   : > { %1250 = vmatprep.subr.bf16.mxu0 %v1321_v1  ;;  %1281 = vmatprep.subr.bf16.mxu1 %v1321_v1  ;;  %v1147_v4 = vld [vmem:[%s1422_s11] sm:$0xff]   ;;  %v1218_v9 = vld [vmem:[%s1422_s11 + $0x8] sm:$0xff]   ;;  %v1442_v16 = vld [vmem:[%s1422_s11 + $0x10] sm:$0xff]  }
  0x10   : > { %v1148_v6 = vunpack.c.l.bf16 %v1147_v4  ;;  %v1149_v7 = vunpack.c.h.bf16 %v1147_v4  ;;  %v1221_v8 = vld [vmem:[%s1422_s11 + $0x20] sm:$0xff]   ;;  %v1222_v10 = vld [vmem:[%s1422_s11 + $0x28] sm:$0xff]   ;;  %v1152_v14 = vunpack.c.l.bf16 %v1218_v9  ;;  %v1153_v15 = vunpack.c.h.bf16 %v1218_v9  ;;  %v1223_v46 = vld [vmem:[%s1422_s11 + $0x30] sm:$0xff]  }
  0x11   : > { %v1439_v11 = vld [vmem:[%s1567_s3] ss:$0 sm:$0xff]  ;;  %v1164_v12 = vunpack.c.l.bf16 %v1221_v8  ;;  %v1165_v13 = vunpack.c.h.bf16 %v1221_v8  ;;  %v1168_v19 = vunpack.c.l.bf16 %v1222_v10  ;;  %v1169_v20 = vunpack.c.h.bf16 %v1222_v10  ;;  %v1220_v56 = vld [vmem:[%s1422_s11 + $0x18] sm:$0xff]  }
  0x12   : > { %1251 = vmatpush3.bf16.msra.mxu0 %v1321_v1  ;;  %1289 = vmatpush3.bf16.msra.mxu1 %v1321_v1  ;;  %v442_v17 = vmul.f32 %v1148_v6, %v1431_v5  ;;  %v443_v18 = vmul.f32 %v1149_v7, %v1431_v5  ;;  %v444_v24 = vmul.f32 %v1152_v14, %v1431_v5  ;;  %v1156_v25 = vunpack.c.l.bf16 %v1442_v16  ;;  %v1327_v0 = vld [vmem:[%s1565_s1] sm:$0xff]   ;;  %v1224_v6 = vld [vmem:[%s1422_s11 + $0x38] sm:$0xff]  }
  0x13   : > { %1252 = vmatprep.subr.bf16.mxu0 %v1322_v2  ;;  %1282 = vmatprep.subr.bf16.mxu1 %v1322_v2  ;;  %v450_v22 = vmul.f32 %v1164_v12, %v1431_v5  ;;  %v451_v23 = vmul.f32 %v1165_v13, %v1431_v5  ;;  %v445_v28 = vmul.f32 %v1153_v15, %v1431_v5  ;;  %v1157_v52 = vunpack.c.h.bf16 %v1442_v16 }
  0x14   : > { %v465_v26 = vadd.f32 %v1439_v11, %v442_v17  ;;  %v466_v27 = vadd.f32 %v1439_v11, %v443_v18  ;;  %v452_v29 = vmul.f32 %v1168_v19, %v1431_v5  ;;  %v467_v33 = vadd.f32 %v1439_v11, %v444_v24 }
  0x15   : > { %v473_v31 = vadd.f32 %v1439_v11, %v450_v22  ;;  %v474_v32 = vadd.f32 %v1439_v11, %v451_v23  ;;  %v453_v34 = vmul.f32 %v1169_v20, %v1431_v5  ;;  %v468_v41 = vadd.f32 %v1439_v11, %v445_v28 }
  0x16   : > { %1253 = vmatpush3.bf16.msra.mxu0 %v1322_v2  ;;  %1290 = vmatpush3.bf16.msra.mxu1 %v1322_v2  ;;  %vm481_vm0 = vcmp.ge.f32.partialorder %v465_v26, 0.0  ;;  %vm482_vm1 = vcmp.ge.f32.partialorder %v466_v27, 0.0  ;;  %v497_v35 = vmul.f32 0.1, %v465_v26  ;;  %v498_v36 = vmul.f32 0.1, %v466_v27 }
  0x17   : > { %1254 = vmatprep.subr.bf16.mxu0 %v1323_v3  ;;  %1283 = vmatprep.subr.bf16.mxu1 %v1323_v3  ;;  %vm489_vm2 = vcmp.ge.f32.partialorder %v473_v31, 0.0  ;;  %vm490_vm3 = vcmp.ge.f32.partialorder %v474_v32, 0.0  ;;  %v505_v37 = vmul.f32 0.1, %v473_v31  ;;  %v506_v38 = vmul.f32 0.1, %v474_v32 }
  0x18   : > { %v513_v39 = vsel %vm481_vm0, %v465_v26, %v497_v35  ;;  %v514_v40 = vsel %vm482_vm1, %v466_v27, %v498_v36  ;;  %v499_v45 = vmul.f32 0.1, %v467_v33  ;;  %vm483_vm4 = vcmp.ge.f32.partialorder %v467_v33, 0.0 }
  0x19   : > { %v529_v42 = vpack.c.bf16 %v514_v40, %v513_v39  ;;  %v521_v43 = vsel %vm489_vm2, %v473_v31, %v505_v37  ;;  %v522_v44 = vsel %vm490_vm3, %v474_v32, %v506_v38  ;;  %v500_v48 = vmul.f32 0.1, %v468_v41 }
  0x1a   : > { %1255 = vmatpush3.bf16.msra.mxu0 %v1323_v3  ;;  %1291 = vmatpush3.bf16.msra.mxu1 %v1323_v3  ;;  %v533_v47 = vpack.c.bf16 %v522_v44, %v521_v43  ;;  %v475_v49 = vadd.f32 %v1439_v11, %v452_v29  ;;  %vm484_vm5 = vcmp.ge.f32.partialorder %v468_v41, 0.0  ;;  %v476_v51 = vadd.f32 %v1439_v11, %v453_v34  ;;  %v1505_v44 = vld [vmem:[%s1569_s5] ss:$0 sm:$0xff] }
  0x1b   : > { %1256 = vmatprep.subr.bf16.mxu0 %v1324_v21  ;;  %1284 = vmatprep.subr.bf16.mxu1 %v1324_v21  ;;  %v446_v53 = vmul.f32 %v1156_v25, %v1431_v5  ;;  %v1172_v55 = vunpack.c.l.bf16 %v1223_v46  ;;  %v515_v57 = vsel %vm483_vm4, %v467_v33, %v499_v45  ;;  %v447_v59 = vmul.f32 %v1157_v52, %v1431_v5 }
  0x1c   : > { %1264 = vmatprep.mubr.bf16.mxu0 %v529_v42  ;;  %1272 = vmatprep.mubr.bf16.mxu1 %v533_v47  ;;  %vm491_vm6 = vcmp.ge.f32.partialorder %v475_v49, 0.0  ;;  %v507_v54 = vmul.f32 0.1, %v475_v49  ;;  %vm492_vm7 = vcmp.ge.f32.partialorder %v476_v51, 0.0  ;;  %v508_v58 = vmul.f32 0.1, %v476_v51 }
  0x1d   : > { %v516_v60 = vsel %vm484_vm5, %v468_v41, %v500_v48  ;;  %v469_v61 = vadd.f32 %v1439_v11, %v446_v53  ;;  %v1173_v62 = vunpack.c.h.bf16 %v1223_v46  ;;  %v454_v63 = vmul.f32 %v1172_v55, %v1431_v5 }
  0x1e   : > { %1257 = vmatpush3.bf16.msra.mxu0 %v1324_v21  ;;  %1292 = vmatpush3.bf16.msra.mxu1 %v1324_v21  ;;  %v523_v1 = vsel %vm491_vm6, %v475_v49, %v507_v54  ;;  %v470_v2 = vadd.f32 %v1439_v11, %v447_v59  ;;  %v1160_v3 = vunpack.c.l.bf16 %v1220_v56  ;;  %v1161_v4 = vunpack.c.h.bf16 %v1220_v56 }
  0x1f   : > { %1258 = vmatprep.subr.bf16.mxu0 %v1325_v30  ;;  %1285 = vmatprep.subr.bf16.mxu1 %v1325_v30  ;;  %v524_v7 = vsel %vm492_vm7, %v476_v51, %v508_v58  ;;  %vm485_vm8 = vcmp.ge.f32.partialorder %v469_v61, 0.0  ;;  %v501_v8 = vmul.f32 0.1, %v469_v61  ;;  %v455_v9 = vmul.f32 %v1173_v62, %v1431_v5 }
  0x20   : > { %vm486_vm9 = vcmp.ge.f32.partialorder %v470_v2, 0.0  ;;  %v502_v10 = vmul.f32 0.1, %v470_v2  ;;  %v477_v12 = vadd.f32 %v1439_v11, %v454_v63  ;;  %v448_v13 = vmul.f32 %v1160_v3, %v1431_v5 }
  0x21   : > { %v517_v14 = vsel %vm485_vm8, %v469_v61, %v501_v8  ;;  %v478_v15 = vadd.f32 %v1439_v11, %v455_v9  ;;  %v449_v16 = vmul.f32 %v1161_v4, %v1431_v5  ;;  %v1176_v17 = vunpack.c.l.bf16 %v1224_v6 }
  0x22   : > { %1259 = vmatpush3.bf16.msra.mxu0 %v1325_v30  ;;  %1293 = vmatpush3.bf16.msra.mxu1 %v1325_v30  ;;  %v518_v18 = vsel %vm486_vm9, %v470_v2, %v502_v10  ;;  %vm493_vm10 = vcmp.ge.f32.partialorder %v477_v12, 0.0  ;;  %v509_v19 = vmul.f32 0.1, %v477_v12  ;;  %v471_v20 = vadd.f32 %v1439_v11, %v448_v13 }
  0x23   : > { %1260 = vmatprep.subr.bf16.mxu0 %v1326_v50  ;;  %1286 = vmatprep.subr.bf16.mxu1 %v1326_v50  ;;  %v530_v21 = vpack.c.bf16 %v516_v60, %v515_v57  ;;  %vm494_vm11 = vcmp.ge.f32.partialorder %v478_v15, 0.0  ;;  %v510_v22 = vmul.f32 0.1, %v478_v15  ;;  %v472_v23 = vadd.f32 %v1439_v11, %v449_v16 }
  0x24   : > { %v534_v24 = vpack.c.bf16 %v524_v7, %v523_v1  ;;  %v531_v25 = vpack.c.bf16 %v518_v18, %v517_v14  ;;  %v525_v26 = vsel %vm493_vm10, %v477_v12, %v509_v19  ;;  %v1177_v27 = vunpack.c.h.bf16 %v1224_v6 }
  0x25   : > { %v526_v28 = vsel %vm494_vm11, %v478_v15, %v510_v22  ;;  %v503_v29 = vmul.f32 0.1, %v471_v20  ;;  %v504_v30 = vmul.f32 0.1, %v472_v23  ;;  %v456_v31 = vmul.f32 %v1176_v17, %v1431_v5 }
  0x26   : > { %1261 = vmatpush3.bf16.msra.mxu0 %v1326_v50  ;;  %1294 = vmatpush3.bf16.msra.mxu1 %v1326_v50  ;;  %v535_v32 = vpack.c.bf16 %v526_v28, %v525_v26  ;;  %vm487_vm12 = vcmp.ge.f32.partialorder %v471_v20, 0.0  ;;  %vm488_vm13 = vcmp.ge.f32.partialorder %v472_v23, 0.0  ;;  %v457_v33 = vmul.f32 %v1177_v27, %v1431_v5  ;;  %v1500_v5 = vld [vmem:[%s1568_s4] ss:$0 sm:$0xff] }
  0x27   : > { %1262 = vmatprep.subr.bf16.mxu0 %v1327_v0  ;;  %1287 = vmatprep.subr.bf16.mxu1 %v1327_v0  ;;  %v479_v34 = vadd.f32 %v1439_v11, %v456_v31  ;;  %v519_v36 = vsel %vm487_vm12, %v471_v20, %v503_v29  ;;  %v520_v37 = vsel %vm488_vm13, %v472_v23, %v504_v30 }
  0x28   : > { %v480_v35 = vadd.f32 %v1439_v11, %v457_v33  ;;  %v532_v41 = vpack.c.bf16 %v520_v37, %v519_v36 }
  0x29   : > { %vm495_vm14 = vcmp.ge.f32.partialorder %v479_v34, 0.0  ;;  %v511_v38 = vmul.f32 0.1, %v479_v34 }
  0x2a   : > { %1263 = vmatpush3.bf16.msra.mxu0 %v1327_v0  ;;  %1295 = vmatpush3.bf16.msra.mxu1 %v1327_v0  ;;  %vm496_vm15 = vcmp.ge.f32.partialorder %v480_v35, 0.0  ;;  %v512_v39 = vmul.f32 0.1, %v480_v35 }
  0x2b   : > { %v527_v40 = vsel %vm495_vm14, %v479_v34, %v511_v38 }
  0x2c   : > { %v528_v42 = vsel %vm496_vm15, %v480_v35, %v512_v39 }
  0x2d   : > { %1265 = vmatmul.mubr.bf16.vlgmr.msra.gmra.mxu0 %v530_v21  ;;  %1273 = vmatmul.mubr.bf16.vlgmr.msra.gmra.mxu1 %v534_v24  ;;  %v536_v43 = vpack.c.bf16 %v528_v42, %v527_v40 }
  0x2e   : > { %1268 = vmatprep.mubr.bf16.mxu0 %v531_v25  ;;  %1276 = vmatprep.mubr.bf16.mxu1 %v535_v32 }
  0x35   : > { %1269 = vmatmul.mubr.bf16.gmra.mxu0 %v532_v41  ;;  %1277 = vmatmul.mubr.bf16.gmra.mxu1 %v536_v43 }
  0xed   : > { %v1266_v11 = vpop.f32.mrf.mxu0  ;;  %v1274_v45 = vpop.f32.mrf.mxu1 }
  0xee   : > { %v774_v46 = vmul.f32 %v1266_v11, %v1500_v5  ;;  %v782_v47 = vmul.f32 %v1274_v45, %v1500_v5 }
  0xef   : > { %v651_v48 = vpop.f32.mrf.mxu0  ;;  %v683_v49 = vpop.f32.mrf.mxu1 }
  0xf0   : > { %v797_v50 = vadd.f32 %v1505_v44, %v774_v46  ;;  %v805_v51 = vadd.f32 %v1505_v44, %v782_v47  ;;  %v772_v52 = vmul.f32 %v1500_v5, %v651_v48  ;;  %v780_v53 = vmul.f32 %v1500_v5, %v683_v49 }
  0xf1   : > { %v1267_v54 = vpop.f32.mrf.mxu0  ;;  %v1275_v55 = vpop.f32.mrf.mxu1 }
  0xf2   : > { %vm813_vm0 = vcmp.ge.f32.partialorder %v797_v50, 0.0  ;;  %v829_v56 = vmul.f32 0.1, %v797_v50  ;;  %vm821_vm1 = vcmp.ge.f32.partialorder %v805_v51, 0.0  ;;  %v837_v57 = vmul.f32 0.1, %v805_v51 }
  0xf3   : > { %v795_v58 = vadd.f32 %v1505_v44, %v772_v52  ;;  %v803_v59 = vadd.f32 %v1505_v44, %v780_v53  ;;  %v775_v60 = vmul.f32 %v1267_v54, %v1500_v5  ;;  %v783_v61 = vmul.f32 %v1275_v55, %v1500_v5  ;;  %v654_v62 = vpop.f32.mrf.mxu0  ;;  %v686_v63 = vpop.f32.mrf.mxu1 }
  0xf4   : > { %v845_v0 = vsel %vm813_vm0, %v797_v50, %v829_v56  ;;  %v853_v1 = vsel %vm821_vm1, %v805_v51, %v837_v57  ;;  %v773_v2 = vmul.f32 %v1500_v5, %v654_v62  ;;  %v781_v3 = vmul.f32 %v1500_v5, %v686_v63 }
  0xf5   : > { %vm811_vm2 = vcmp.ge.f32.partialorder %v795_v58, 0.0  ;;  %v827_v4 = vmul.f32 0.1, %v795_v58  ;;  %vm819_vm3 = vcmp.ge.f32.partialorder %v803_v59, 0.0  ;;  %v835_v6 = vmul.f32 0.1, %v803_v59  ;;  %v1270_v7 = vpop.f32.mrf.mxu0  ;;  %v1278_v8 = vpop.f32.mrf.mxu1 }
  0xf6   : > { %v798_v9 = vadd.f32 %v1505_v44, %v775_v60  ;;  %v806_v10 = vadd.f32 %v1505_v44, %v783_v61  ;;  %v796_v12 = vadd.f32 %v1505_v44, %v773_v2  ;;  %v804_v13 = vadd.f32 %v1505_v44, %v781_v3 }
  0xf7   : > { %v843_v14 = vsel %vm811_vm2, %v795_v58, %v827_v4  ;;  %v851_v15 = vsel %vm819_vm3, %v803_v59, %v835_v6  ;;  %v778_v16 = vmul.f32 %v1270_v7, %v1500_v5  ;;  %v786_v17 = vmul.f32 %v1278_v8, %v1500_v5  ;;  %v667_v18 = vpop.f32.mrf.mxu0  ;;  %v699_v19 = vpop.f32.mrf.mxu1 }
  0xf8   : > { %vm814_vm4 = vcmp.ge.f32.partialorder %v798_v9, 0.0  ;;  %v830_v20 = vmul.f32 0.1, %v798_v9  ;;  %vm822_vm5 = vcmp.ge.f32.partialorder %v806_v10, 0.0  ;;  %v838_v21 = vmul.f32 0.1, %v806_v10 }
  0xf9   : > { %vm812_vm6 = vcmp.ge.f32.partialorder %v796_v12, 0.0  ;;  %v828_v22 = vmul.f32 0.1, %v796_v12  ;;  %vm820_vm7 = vcmp.ge.f32.partialorder %v804_v13, 0.0  ;;  %v836_v23 = vmul.f32 0.1, %v804_v13  ;;  %v1271_v24 = vpop.f32.mrf.mxu0  ;;  %v1279_v25 = vpop.f32.mrf.mxu1 }
  0xfa   : > { %v846_v26 = vsel %vm814_vm4, %v798_v9, %v830_v20  ;;  %v854_v27 = vsel %vm822_vm5, %v806_v10, %v838_v21  ;;  %v801_v28 = vadd.f32 %v1505_v44, %v778_v16  ;;  %v809_v29 = vadd.f32 %v1505_v44, %v786_v17 }
  0xfb   : > { %v1186_v30 = vpack.c.bf16 %v846_v26, %v845_v0  ;;  %v1206_v31 = vpack.c.bf16 %v854_v27, %v853_v1  ;;  %v844_v32 = vsel %vm812_vm6, %v796_v12, %v828_v22  ;;  %v852_v33 = vsel %vm820_vm7, %v804_v13, %v836_v23  ;;  %v670_v34 = vpop.f32.mrf.mxu0  ;;  %v702_v40 = vpop.f32.mrf.mxu1 }
  0xfc   : > { %v1181_v35 = vpack.c.bf16 %v844_v32, %v843_v14  ;;  %v1201_v36 = vpack.c.bf16 %v852_v33, %v851_v15  ;;  %v833_v37 = vmul.f32 0.1, %v801_v28  ;;  %v776_v38 = vmul.f32 %v1500_v5, %v667_v18 }
  0xfd   : > { %1225 = vst [vmem:[%s1530_s13 + $0x8] sm:$0xff] %v1186_v30   ;;  %1229 = vst [vmem:[%s1530_s13 + $0x28] sm:$0xff] %v1206_v31   ;;  %v784_v39 = vmul.f32 %v1500_v5, %v699_v19  ;;  %vm817_vm8 = vcmp.ge.f32.partialorder %v801_v28, 0.0  ;;  %v779_v41 = vmul.f32 %v1271_v24, %v1500_v5  ;;  %v787_v42 = vmul.f32 %v1279_v25, %v1500_v5 }
  0xfe   : > { %1182 = vst [vmem:[%s1530_s13] sm:$0xff] %v1181_v35   ;;  %1228 = vst [vmem:[%s1530_s13 + $0x20] sm:$0xff] %v1201_v36   ;;  %v777_v43 = vmul.f32 %v1500_v5, %v670_v34  ;;  %vm825_vm9 = vcmp.ge.f32.partialorder %v809_v29, 0.0  ;;  %v841_v11 = vmul.f32 0.1, %v809_v29  ;;  %v799_v45 = vadd.f32 %v1505_v44, %v776_v38 }
  0xff   : > { %v807_v46 = vadd.f32 %v1505_v44, %v784_v39  ;;  %v802_v47 = vadd.f32 %v1505_v44, %v779_v41  ;;  %v810_v48 = vadd.f32 %v1505_v44, %v787_v42  ;;  %v785_v50 = vmul.f32 %v1500_v5, %v702_v40 }
 0x100   : > { %v800_v49 = vadd.f32 %v1505_v44, %v777_v43  ;;  %v849_v51 = vsel %vm817_vm8, %v801_v28, %v833_v37  ;;  %vm815_vm10 = vcmp.ge.f32.partialorder %v799_v45, 0.0  ;;  %v831_v52 = vmul.f32 0.1, %v799_v45 }
 0x101   : > { %vm818_vm11 = vcmp.ge.f32.partialorder %v802_v47, 0.0  ;;  %v834_v53 = vmul.f32 0.1, %v802_v47  ;;  %vm826_vm12 = vcmp.ge.f32.partialorder %v810_v48, 0.0  ;;  %v842_v54 = vmul.f32 0.1, %v810_v48 }
 0x102   : > { %v857_v55 = vsel %vm825_vm9, %v809_v29, %v841_v11  ;;  %vm823_vm13 = vcmp.ge.f32.partialorder %v807_v46, 0.0  ;;  %vm816_vm14 = vcmp.ge.f32.partialorder %v800_v49, 0.0  ;;  %v832_v56 = vmul.f32 0.1, %v800_v49 }
 0x103   : > { %v839_v57 = vmul.f32 0.1, %v807_v46  ;;  %v850_v58 = vsel %vm818_vm11, %v802_v47, %v834_v53  ;;  %v858_v59 = vsel %vm826_vm12, %v810_v48, %v842_v54  ;;  %v808_v5 = vadd.f32 %v1505_v44, %v785_v50 }
 0x104   : > { %v847_v60 = vsel %vm815_vm10, %v799_v45, %v831_v52  ;;  %v1196_v61 = vpack.c.bf16 %v850_v58, %v849_v51  ;;  %v1216_v62 = vpack.c.bf16 %v858_v59, %v857_v55  ;;  %v848_v63 = vsel %vm816_vm14, %v800_v49, %v832_v56 }
 0x105   : > { %v1191_v0 = vpack.c.bf16 %v848_v63, %v847_v60  ;;  %vm824_vm15 = vcmp.ge.f32.partialorder %v808_v5, 0.0  ;;  %v840_v1 = vmul.f32 0.1, %v808_v5  ;;  %v855_v2 = vsel %vm823_vm13, %v807_v46, %v839_v57 }
 0x106   : > { %1227 = vst [vmem:[%s1530_s13 + $0x18] sm:$0xff] %v1196_v61   ;;  %1231 = vst [vmem:[%s1530_s13 + $0x38] sm:$0xff] %v1216_v62  }
 0x107   : > { %1226 = vst [vmem:[%s1530_s13 + $0x10] sm:$0xff] %v1191_v0   ;;  %v856_v3 = vsel %vm824_vm15, %v808_v5, %v840_v1 }
 0x108   : > { %v1211_v4 = vpack.c.bf16 %v856_v3, %v855_v2 }
 0x10a   : > { %1230 = vst [vmem:[%s1530_s13 + $0x30] sm:$0xff] %v1211_v4  }
 0x10b PF: > { %s16_s23 = sadd.s32 1, %s1350_s23   ;;  %s1571_s21 = smov %s1346_s22 }
 0x10c   : > { %p13_p5 = scmp.ge.s32.totalorder %s16_s23, 6   ;;  %s1572_s22 = smov %s1574_s24 }
 0x10e   :  { %15 = sbr.rel (!%p13_p5) target bundleno = 2 (0x2), region = 97 }

// kernel: fwd.3
= control target key start
LH: loop header
LB: loop body
LE: loop exit
PB: predicated region body
PF: predicated region fallthrough
CT: control target
= control target key end

     0   :  { %s1385_s21 = smov 0   ;;  %s1387_s22 = smov 0   ;;  %s1560_s0 = inlined_call_operand.vmem [shape: bf16[512,128], index: 0, kind: input, shape index: {}]   ;;  %s1561_s1 = inlined_call_operand.vmem [shape: bf16[128,128], index: 1, kind: input, shape index: {}]   ;;  %s1562_s2 = inlined_call_operand.vmem [shape: f32[512,4], index: 2, kind: input, shape index: {}]   ;;  %s1563_s3 = inlined_call_operand.vmem [shape: f32[4,128], index: 3, kind: input, shape index: {}]   ;;  %s1564_s4 = inlined_call_operand.vmem [shape: f32[1,4], index: 4, kind: input, shape index: {}]   ;;  %s1565_s5 = inlined_call_operand.vmem [shape: f32[1,4], index: 5, kind: input, shape index: {}]   ;;  %s1566_s6 = inlined_call_operand.vmem [shape: f32[512,128], index: 6, kind: output, shape index: {}]  }
   0x1   :  { %s1389_s23 = smov 0  }
   0x2 LB: > { %s35_s24 = sadd.s32 1, %s1344_s22  ;;  %p1151_p0 = scmp.ge.s32.totalorder %s1348_s23, 1  ;;  %s1348_s23 = sphi %s1389_s23, %s16_s23   ;;  %s1344_s22 = sphi %s1387_s22, %s1568_s22   ;;  %s1340_s21 = sphi %s1385_s21, %s1567_s21  }
   0x3   : > { %p37_p1 = scmp.ge.s32.totalorder %s35_s24, 4  ;;  %p275_p2 = scmp.lt.s32.totalorder %s1348_s23, 5 }
   0x5   : > { %s1570_s24 = smov (%p37_p1, %s35_s24), 0  ;;  %p276_p3 = pnand %p1151_p0, %p275_p2 }
   0x6   : > { %s1152_s29 = sshll.u32 (!%p276_p3), %s1340_s21, 4 }
   0x7   : > { %279 = sbr.rel (%p276_p3) target bundleno = 271 (0x10f), region = 44  ;;  %p329_p4 = scmp.lt.s32.totalorder (!%p276_p3), %s1152_s29, 63 }
   0xc   : > { %v1310_v0 = vld [vmem:[%s1561_s1 + $0x38] sm:$0xff]   ;;  %v1311_v1 = vld [vmem:[%s1561_s1 + $0x30] sm:$0xff]   ;;  %v1312_v2 = vld [vmem:[%s1561_s1 + $0x28] sm:$0xff]   ;;  %s1572_s29 = smov (!%p329_p4, %s1152_s29), 63  ;;  %vm822_vm0 = vcmask 1043456   ;;  %vm773_vm1 = vcmask 31744  }
   0xd   : > { %1228 = vmatprep.subr.bf16.mxu0 %v1310_v0  ;;  %v1313_v3 = vld [vmem:[%s1561_s1 + $0x20] sm:$0xff]   ;;  %s1155_s10 = sshll.u32 %s1572_s29, 3  ;;  %s1153_s20 = sshll.u32 %s1572_s29, 2  ;;  %v1314_v18 = vld [vmem:[%s1561_s1 + $0x18] sm:$0xff]   ;;  %v1315_v33 = vld [vmem:[%s1561_s1 + $0x10] sm:$0xff]  }
   0xe   : > { %1229 = vmatpush3.bf16.msra.mxu0 %v1310_v0  ;;  %v772_v4 = vld [vmem:[%s1563_s3] sm:$0xf]  ;;  %s1426_s15 = scalar_lea.vmem %s1562_s2, %s1155_s10  ;;  %s1447_s26 = scalar_lea.vmem %s1560_s0, %s1153_s20  ;;  %v1316_v49 = vld [vmem:[%s1561_s1 + $0x8] sm:$0xff]  }
   0xf   : > { %1230 = vmatprep.subr.bf16.mxu0 %v1311_v1  ;;  %v1431_v5 = vld [vmem:[%s1564_s4] ss:$0 sm:$0xff]  ;;  %1260 = vmatprep.subr.msk.mxu1 %vm822_vm0, %v772_v4  ;;  %v663_v8 = vld [vmem:[%s1426_s15 + $0x8] sm:$0xff]  ;;  %v664_v11 = vld [vmem:[%s1426_s15 + $0x10] sm:$0xff] }
  0x10   : > { %v1436_v6 = vld [vmem:[%s1565_s5] ss:$0 sm:$0xff]  ;;  %1261 = vmatpush3.msk.msra.mxu1 %vm822_vm0, %v772_v4  ;;  %v686_v10 = vmul.f32 %v1431_v5, %v663_v8  ;;  %v687_v12 = vmul.f32 %v1431_v5, %v664_v11  ;;  %v665_v13 = vld [vmem:[%s1426_s15 + $0x18] sm:$0xff]  ;;  %v667_v21 = vld [vmem:[%s1426_s15 + $0x28] sm:$0xff] }
  0x11   : > { %v662_v7 = vld [vmem:[%s1426_s15] sm:$0xff]  ;;  %v688_v16 = vmul.f32 %v1431_v5, %v665_v13  ;;  %v668_v27 = vld [vmem:[%s1426_s15 + $0x30] sm:$0xff]  ;;  %v669_v28 = vld [vmem:[%s1426_s15 + $0x38] sm:$0xff]  ;;  %v690_v31 = vmul.f32 %v1431_v5, %v667_v21 }
  0x12   : > { %1231 = vmatpush3.bf16.msra.mxu0 %v1311_v1  ;;  %v685_v9 = vmul.f32 %v1431_v5, %v662_v7  ;;  %v709_v15 = vadd.f32 %v1436_v6, %v686_v10  ;;  %v1318_v17 = vld [vmem:[%s1447_s26] sm:$0xff]   ;;  %v710_v19 = vadd.f32 %v1436_v6, %v687_v12  ;;  %v691_v32 = vmul.f32 %v1431_v5, %v668_v27  ;;  %v671_v41 = vld [vmem:[%s1426_s15 + $0x48] sm:$0xff]  ;;  %v672_v42 = vld [vmem:[%s1426_s15 + $0x50] sm:$0xff] }
  0x13   : > { %1232 = vmatprep.subr.bf16.mxu0 %v1312_v2  ;;  %v666_v20 = vld [vmem:[%s1426_s15 + $0x20] sm:$0xff]  ;;  %1244 = vmatprep.mubr.bf16.mxu0 %v1318_v17  ;;  %v711_v25 = vadd.f32 %v1436_v6, %v688_v16  ;;  %v713_v37 = vadd.f32 %v1436_v6, %v690_v31  ;;  %v692_v39 = vmul.f32 %v1431_v5, %v669_v28  ;;  %v673_v46 = vld [vmem:[%s1426_s15 + $0x58] sm:$0xff]  ;;  %v675_v1 = vld [vmem:[%s1426_s15 + $0x68] sm:$0xff] }
  0x14   : > { %v708_v14 = vadd.f32 %v1436_v6, %v685_v9  ;;  %vm725_vm3 = vcmp.ge.f32.partialorder %v709_v15, 0.0  ;;  %v741_v23 = vmul.f32 0.1, %v709_v15  ;;  %vm726_vm4 = vcmp.ge.f32.partialorder %v710_v19, 0.0  ;;  %v670_v40 = vld [vmem:[%s1426_s15 + $0x40] sm:$0xff]  ;;  %v677_v13 = vld [vmem:[%s1426_s15 + $0x78] sm:$0xff] }
  0x15   : > { %v742_v24 = vmul.f32 0.1, %v710_v19  ;;  %v689_v26 = vmul.f32 %v1431_v5, %v666_v20  ;;  %vm727_vm5 = vcmp.ge.f32.partialorder %v711_v25, 0.0  ;;  %v743_v35 = vmul.f32 0.1, %v711_v25  ;;  %v674_v57 = vld [vmem:[%s1426_s15 + $0x60] sm:$0xff] }
  0x16   : > { %1233 = vmatpush3.bf16.msra.mxu0 %v1312_v2  ;;  %vm724_vm2 = vcmp.ge.f32.partialorder %v708_v14, 0.0  ;;  %v740_v22 = vmul.f32 0.1, %v708_v14  ;;  %v757_v30 = vsel %vm725_vm3, %v709_v15, %v741_v23  ;;  %v714_v38 = vadd.f32 %v1436_v6, %v691_v32  ;;  %v1317_v61 = vld [vmem:[%s1561_s1] sm:$0xff]   ;;  %v676_v2 = vld [vmem:[%s1426_s15 + $0x70] sm:$0xff]  ;;  %v1321_v27 = vld [vmem:[%s1447_s26 + $0x18] sm:$0xff]   ;;  %s1533_s15 = scalar_lea.vmem %s1566_s6, %s1155_s10 }
  0x17   : > { %1234 = vmatprep.subr.bf16.mxu0 %v1313_v3  ;;  %v758_v34 = vsel %vm726_vm4, %v710_v19, %v742_v24  ;;  %v712_v36 = vadd.f32 %v1436_v6, %v689_v26  ;;  %v759_v43 = vsel %vm727_vm5, %v711_v25, %v743_v35  ;;  %v693_v45 = vmul.f32 %v1431_v5, %v670_v40  ;;  %v1320_v19 = vld [vmem:[%s1447_s26 + $0x10] sm:$0xff]   ;;  %v1323_v32 = vld [vmem:[%s1447_s26 + $0x28] sm:$0xff]  }
  0x18   : > { %v756_v29 = vsel %vm724_vm2, %v708_v14, %v740_v22  ;;  %vm729_vm7 = vcmp.ge.f32.partialorder %v713_v37, 0.0  ;;  %v745_v47 = vmul.f32 0.1, %v713_v37  ;;  %vm730_vm8 = vcmp.ge.f32.partialorder %v714_v38, 0.0  ;;  %v1319_v14 = vld [vmem:[%s1447_s26 + $0x8] sm:$0xff]  }
  0x19   : > { %1262 = vmatprep.mubr.msk.f32.mxu1 %vm773_vm1, %v756_v29  ;;  %vm728_vm6 = vcmp.ge.f32.partialorder %v712_v36, 0.0  ;;  %v744_v44 = vmul.f32 0.1, %v712_v36  ;;  %v746_v48 = vmul.f32 0.1, %v714_v38  ;;  %v715_v51 = vadd.f32 %v1436_v6, %v692_v39 }
  0x1a   : > { %1235 = vmatpush3.bf16.msra.mxu0 %v1313_v3  ;;  %1263 = vmatmul.mubr.msk.f32.vlgmr.msra.gmra.mxu1 %vm773_vm1, %v757_v30  ;;  %v716_v52 = vadd.f32 %v1436_v6, %v693_v45  ;;  %v694_v53 = vmul.f32 %v1431_v5, %v671_v41  ;;  %v761_v54 = vsel %vm729_vm7, %v713_v37, %v745_v47  ;;  %v1322_v30 = vld [vmem:[%s1447_s26 + $0x20] sm:$0xff]  }
  0x1b   : > { %1236 = vmatprep.subr.bf16.mxu0 %v1314_v18  ;;  %1265 = vmatprep.mubr.msk.f32.mxu1 %vm773_vm1, %v758_v34  ;;  %v760_v50 = vsel %vm728_vm6, %v712_v36, %v744_v44  ;;  %v695_v55 = vmul.f32 %v1431_v5, %v672_v42  ;;  %v696_v56 = vmul.f32 %v1431_v5, %v673_v46  ;;  %vm731_vm9 = vcmp.ge.f32.partialorder %v715_v51, 0.0  ;;  %v1325_v34 = vld [vmem:[%s1447_s26 + $0x38] sm:$0xff]  }
  0x1c   : > { %v762_v58 = vsel %vm730_vm8, %v714_v38, %v746_v48  ;;  %v747_v59 = vmul.f32 0.1, %v715_v51  ;;  %v748_v60 = vmul.f32 0.1, %v716_v52  ;;  %vm732_vm10 = vcmp.ge.f32.partialorder %v716_v52, 0.0 }
  0x1d   : > { %v717_v62 = vadd.f32 %v1436_v6, %v694_v53  ;;  %v718_v63 = vadd.f32 %v1436_v6, %v695_v55  ;;  %v697_v0 = vmul.f32 %v1431_v5, %v674_v57  ;;  %v719_v3 = vadd.f32 %v1436_v6, %v696_v56 }
  0x1e   : > { %1237 = vmatpush3.bf16.msra.mxu0 %v1314_v18  ;;  %1266 = vmatmul.mubr.msk.f32.gmra.mxu1 %vm773_vm1, %v759_v43  ;;  %v763_v4 = vsel %vm731_vm9, %v715_v51, %v747_v59  ;;  %v764_v7 = vsel %vm732_vm10, %v716_v52, %v748_v60  ;;  %v698_v9 = vmul.f32 %v1431_v5, %v675_v1 }
  0x1f   : > { %1238 = vmatprep.subr.bf16.mxu0 %v1315_v33  ;;  %1268 = vmatprep.mubr.msk.f32.mxu1 %vm773_vm1, %v760_v50  ;;  %v749_v8 = vmul.f32 0.1, %v717_v62  ;;  %vm733_vm11 = vcmp.ge.f32.partialorder %v717_v62, 0.0  ;;  %v750_v10 = vmul.f32 0.1, %v718_v63  ;;  %v720_v11 = vadd.f32 %v1436_v6, %v697_v0 }
  0x20   : > { %v699_v12 = vmul.f32 %v1431_v5, %v676_v2  ;;  %vm734_vm12 = vcmp.ge.f32.partialorder %v718_v63, 0.0  ;;  %v751_v16 = vmul.f32 0.1, %v719_v3  ;;  %v721_v17 = vadd.f32 %v1436_v6, %v698_v9 }
  0x21   : > { %v765_v15 = vsel %vm733_vm11, %v717_v62, %v749_v8  ;;  %v700_v18 = vmul.f32 %v1431_v5, %v677_v13  ;;  %v766_v20 = vsel %vm734_vm12, %v718_v63, %v750_v10  ;;  %vm735_vm13 = vcmp.ge.f32.partialorder %v719_v3, 0.0 }
  0x22   : > { %1239 = vmatpush3.bf16.msra.mxu0 %v1315_v33  ;;  %1269 = vmatmul.mubr.msk.f32.gmra.mxu1 %vm773_vm1, %v761_v54  ;;  %v752_v21 = vmul.f32 0.1, %v720_v11  ;;  %v722_v22 = vadd.f32 %v1436_v6, %v699_v12  ;;  %vm736_vm14 = vcmp.ge.f32.partialorder %v720_v11, 0.0  ;;  %v767_v23 = vsel %vm735_vm13, %v719_v3, %v751_v16  ;;  %v1324_v33 = vld [vmem:[%s1447_s26 + $0x30] sm:$0xff]  }
  0x23   : > { %1240 = vmatprep.subr.bf16.mxu0 %v1316_v49  ;;  %1271 = vmatprep.mubr.msk.f32.mxu1 %vm773_vm1, %v762_v58  ;;  %v753_v24 = vmul.f32 0.1, %v721_v17  ;;  %v723_v25 = vadd.f32 %v1436_v6, %v700_v18  ;;  %vm737_vm15 = vcmp.ge.f32.partialorder %v721_v17, 0.0 }
  0x24   : > { %v768_v5 = vsel %vm736_vm14, %v720_v11, %v752_v21  ;;  %v754_v26 = vmul.f32 0.1, %v722_v22  ;;  %vm738_vm0 = vcmp.ge.f32.partialorder %v722_v22, 0.0 }
  0x25   : > { %v769_v28 = vsel %vm737_vm15, %v721_v17, %v753_v24  ;;  %v755_v29 = vmul.f32 0.1, %v723_v25  ;;  %vm739_vm2 = vcmp.ge.f32.partialorder %v723_v25, 0.0 }
  0x26   : > { %1241 = vmatpush3.bf16.msra.mxu0 %v1316_v49  ;;  %1272 = vmatmul.mubr.msk.f32.gmra.mxu1 %vm773_vm1, %v763_v4  ;;  %v770_v31 = vsel %vm738_vm0, %v722_v22, %v754_v26 }
  0x27   : > { %1242 = vmatprep.subr.bf16.mxu0 %v1317_v61  ;;  %1274 = vmatprep.mubr.msk.f32.mxu1 %vm773_vm1, %v764_v7  ;;  %v771_v6 = vsel %vm739_vm2, %v723_v25, %v755_v29 }
  0x2a   : > { %1243 = vmatpush3.bf16.msra.mxu0 %v1317_v61  ;;  %1275 = vmatmul.mubr.msk.f32.gmra.mxu1 %vm773_vm1, %v765_v15 }
  0x2b   : > { %1277 = vmatprep.mubr.msk.f32.mxu1 %vm773_vm1, %v766_v20 }
  0x2d   : > { %1245 = vmatmul.mubr.bf16.vlgmr.msra.gmra.mxu0 %v1319_v14 }
  0x2e   : > { %1248 = vmatprep.mubr.bf16.mxu0 %v1320_v19  ;;  %1278 = vmatmul.mubr.msk.f32.gmra.mxu1 %vm773_vm1, %v767_v23 }
  0x2f   : > { %1280 = vmatprep.mubr.msk.f32.mxu1 %vm773_vm1, %v768_v5 }
  0x32   : > { %1281 = vmatmul.mubr.msk.f32.gmra.mxu1 %vm773_vm1, %v769_v28 }
  0x33   : > { %1283 = vmatprep.mubr.msk.f32.mxu1 %vm773_vm1, %v770_v31 }
  0x35   : > { %1249 = vmatmul.mubr.bf16.gmra.mxu0 %v1321_v27 }
  0x36   : > { %1252 = vmatprep.mubr.bf16.mxu0 %v1322_v30  ;;  %1284 = vmatmul.mubr.msk.f32.gmra.mxu1 %vm773_vm1, %v771_v6 }
  0x3d   : > { %1253 = vmatmul.mubr.bf16.gmra.mxu0 %v1323_v32 }
  0x3e   : > { %1256 = vmatprep.mubr.bf16.mxu0 %v1324_v33 }
  0x45   : > { %1257 = vmatmul.mubr.bf16.gmra.mxu0 %v1325_v34 }
  0xda   : > { %v1264_v35 = vpop.f32.mrf.mxu1 }
  0xdc   : > { %v892_v36 = vpop.f32.mrf.mxu1 }
  0xde   : > { %v1267_v37 = vpop.f32.mrf.mxu1 }
  0xe0   : > { %v902_v38 = vpop.f32.mrf.mxu1 }
  0xe2   : > { %v1270_v39 = vpop.f32.mrf.mxu1 }
  0xe4   : > { %v912_v40 = vpop.f32.mrf.mxu1 }
  0xe6   : > { %v1273_v41 = vpop.f32.mrf.mxu1 }
  0xe8   : > { %v922_v42 = vpop.f32.mrf.mxu1 }
  0xea   : > { %v1276_v43 = vpop.f32.mrf.mxu1 }
  0xec   : > { %v932_v46 = vpop.f32.mrf.mxu1 }
  0xed   : > { %v1246_v44 = vpop.f32.mrf.mxu0 }
  0xee   : > { %v989_v45 = vadd.f32 %v1246_v44, %v902_v38  ;;  %v1279_v49 = vpop.f32.mrf.mxu1 }
  0xef   : > { %v564_v47 = vpop.f32.mrf.mxu0 }
  0xf0   : > { %1005 = vst [vmem:[%s1533_s15 + $0x10] sm:$0xff] %v989_v45  ;;  %v987_v48 = vadd.f32 %v892_v36, %v564_v47  ;;  %v942_v53 = vpop.f32.mrf.mxu1 }
  0xf1   : > { %v1247_v50 = vpop.f32.mrf.mxu0 }
  0xf2   : > { %1003 = vst [vmem:[%s1533_s15] sm:$0xff] %v987_v48  ;;  %v990_v51 = vadd.f32 %v1267_v37, %v1247_v50  ;;  %v1282_v58 = vpop.f32.mrf.mxu1 }
  0xf3   : > { %v567_v52 = vpop.f32.mrf.mxu0 }
  0xf4   : > { %1006 = vst [vmem:[%s1533_s15 + $0x18] sm:$0xff] %v990_v51  ;;  %v988_v54 = vadd.f32 %v1264_v35, %v567_v52  ;;  %v952_v63 = vpop.f32.mrf.mxu1 }
  0xf5   : > { %v1250_v55 = vpop.f32.mrf.mxu0 }
  0xf6   : > { %1004 = vst [vmem:[%s1533_s15 + $0x8] sm:$0xff] %v988_v54  ;;  %v993_v56 = vadd.f32 %v1250_v55, %v922_v42  ;;  %v1285_v4 = vpop.f32.mrf.mxu1 }
  0xf7   : > { %v580_v57 = vpop.f32.mrf.mxu0 }
  0xf8   : > { %1009 = vst [vmem:[%s1533_s15 + $0x30] sm:$0xff] %v993_v56  ;;  %v991_v59 = vadd.f32 %v912_v40, %v580_v57  ;;  %v962_v11 = vpop.f32.mrf.mxu1 }
  0xf9   : > { %v1251_v60 = vpop.f32.mrf.mxu0 }
  0xfa   : > { %1007 = vst [vmem:[%s1533_s15 + $0x20] sm:$0xff] %v991_v59  ;;  %v994_v61 = vadd.f32 %v1273_v41, %v1251_v60 }
  0xfb   : > { %v583_v62 = vpop.f32.mrf.mxu0 }
  0xfc   : > { %1010 = vst [vmem:[%s1533_s15 + $0x38] sm:$0xff] %v994_v61  ;;  %v992_v0 = vadd.f32 %v1270_v39, %v583_v62 }
  0xfd   : > { %v1254_v1 = vpop.f32.mrf.mxu0 }
  0xfe   : > { %1008 = vst [vmem:[%s1533_s15 + $0x28] sm:$0xff] %v992_v0  ;;  %v997_v2 = vadd.f32 %v1254_v1, %v942_v53 }
  0xff   : > { %v596_v3 = vpop.f32.mrf.mxu0 }
 0x100   : > { %1013 = vst [vmem:[%s1533_s15 + $0x50] sm:$0xff] %v997_v2  ;;  %v995_v7 = vadd.f32 %v932_v46, %v596_v3 }
 0x101   : > { %v1255_v8 = vpop.f32.mrf.mxu0 }
 0x102   : > { %1011 = vst [vmem:[%s1533_s15 + $0x40] sm:$0xff] %v995_v7  ;;  %v998_v9 = vadd.f32 %v1279_v49, %v1255_v8 }
 0x103   : > { %v599_v10 = vpop.f32.mrf.mxu0 }
 0x104   : > { %1014 = vst [vmem:[%s1533_s15 + $0x58] sm:$0xff] %v998_v9  ;;  %v996_v12 = vadd.f32 %v1276_v43, %v599_v10 }
 0x105   : > { %v1258_v13 = vpop.f32.mrf.mxu0 }
 0x106   : > { %1012 = vst [vmem:[%s1533_s15 + $0x48] sm:$0xff] %v996_v12  ;;  %v1001_v14 = vadd.f32 %v1258_v13, %v962_v11 }
 0x107   : > { %v612_v15 = vpop.f32.mrf.mxu0 }
 0x108   : > { %1017 = vst [vmem:[%s1533_s15 + $0x70] sm:$0xff] %v1001_v14  ;;  %v999_v16 = vadd.f32 %v952_v63, %v612_v15 }
 0x109   : > { %v1259_v17 = vpop.f32.mrf.mxu0 }
 0x10a   : > { %1015 = vst [vmem:[%s1533_s15 + $0x60] sm:$0xff] %v999_v16  ;;  %v1002_v18 = vadd.f32 %v1285_v4, %v1259_v17 }
 0x10b   : > { %v615_v19 = vpop.f32.mrf.mxu0 }
 0x10c   : > { %1018 = vst [vmem:[%s1533_s15 + $0x78] sm:$0xff] %v1002_v18  ;;  %v1000_v20 = vadd.f32 %v1282_v58, %v615_v19 }
 0x10e   : > { %1016 = vst [vmem:[%s1533_s15 + $0x68] sm:$0xff] %v1000_v20 }
 0x10f PF: > { %s16_s23 = sadd.s32 1, %s1348_s23   ;;  %s1567_s21 = smov %s1344_s22 }
 0x110   : > { %p13_p5 = scmp.ge.s32.totalorder %s16_s23, 6   ;;  %s1568_s22 = smov %s1570_s24 }
 0x112   :  { %15 = sbr.rel (!%p13_p5) target bundleno = 2 (0x2), region = 91 }

</bundles_post_ra>
